<compile_context>
chip_gen: v6e
topology: v6e:2x2x1
jax: 0.10.0
libtpu: 0.0.40
codegen_flags: <defaults>
</compile_context>

<pallas_src>
import functools

import jax
import jax.numpy as jnp
from jax import lax
from jax.experimental import pallas as pl
from jax.experimental.pallas import tpu as pltpu


# ------------------------------------------------------------------ kernels --

def _sums_kernel(p_ref, g_ref, out_ref, *, m_rows, chunk, masked):
    """sum((p-g)^2) and sum(|p-g|) over (tm, 128) row-blocks.

    Grid: (num_row_blocks,) -- a pure reduction axis; out_ref is a (2, 8, 128)
    accumulator resident across the whole grid (zeroed at step 0, reduced to
    two scalars in the wrapper).  The block body is strip-mined into `chunk`
    row slices so only the two (8, 128) running accumulators stay live.
    Ragged-tail masking runs on the final block only (gated by pl.when).
    """
    s = pl.program_id(0)

    @pl.when(s == 0)
    def _init():
        out_ref[...] = jnp.zeros_like(out_ref)

    tm = p_ref.shape[0]
    base = s * tm
    n_chunks = tm // chunk
    zeros = (jnp.zeros((8, 128), jnp.float32), jnp.zeros((8, 128), jnp.float32))

    def make_body(use_mask):
        def body(i, accs):
            acc_sq, acc_ab = accs
            off = pl.multiple_of(i * chunk, chunk)
            p = p_ref[pl.ds(off, chunk), :].astype(jnp.float32)
            g = g_ref[pl.ds(off, chunk), :].astype(jnp.float32)
            d = p - g
            if use_mask:
                # Lane-independent row mask: compare on a (chunk, 1) column.
                rows = base + off + lax.broadcasted_iota(jnp.int32, (chunk, 1), 0)
                d = jnp.where(rows < m_rows, d, 0.0)
            acc_sq = acc_sq + (d * d).reshape(chunk // 8, 8, 128).sum(axis=0)
            acc_ab = acc_ab + jnp.abs(d).reshape(chunk // 8, 8, 128).sum(axis=0)
            return acc_sq, acc_ab
        return body

    def run(use_mask):
        acc_sq, acc_ab = lax.fori_loop(0, n_chunks, make_body(use_mask), zeros)
        out_ref[0] += acc_sq
        out_ref[1] += acc_ab

    if not masked:
        run(False)
    else:
        is_tail = base + tm > m_rows

        @pl.when(jnp.logical_not(is_tail))
        def _full():
            run(False)

        @pl.when(is_tail)
        def _tail():
            run(True)


def _frame_kernel(p_ref, g_ref, sums_ref, ddr_ref, prev_p, prev_g,
                  *, tau, eps, sub):
    """Fully fused MSE + L1 + DDR over a (B, T) frame grid (one HBM pass).

    Each grid step streams one lane-dense (R, 128) frame of pred and gt and
      * accumulates sum((p-g)^2) / sum(|p-g|) into the resident sums_ref,
      * for t > 0, forms the frame gap vs. the previous frame (carried in VMEM
        scratch), takes a full-frame softmax and adds the DiffDivReg KL term
        into the resident ddr_ref.
    The grid is fully serial ("arbitrary", "arbitrary"): the prev-frame carry
    and the globally-resident accumulators require it.
    """
    b = pl.program_id(0)
    t = pl.program_id(1)

    @pl.when(jnp.logical_and(b == 0, t == 0))
    def _init():
        sums_ref[...] = jnp.zeros_like(sums_ref)
        ddr_ref[...] = jnp.zeros_like(ddr_ref)

    p = p_ref[0, 0].astype(jnp.float32)          # (R, 128)
    g = g_ref[0, 0].astype(jnp.float32)
    r = p.shape[0]

    # --- MSE / L1 partial sums (every frame, including t == 0) ---------------
    d = p - g
    if sub == 8:
        sums_ref[0] += (d * d).reshape(r // 8, 8, 128).sum(axis=0)
        sums_ref[1] += jnp.abs(d).reshape(r // 8, 8, 128).sum(axis=0)
    else:
        sums_ref[0] += (d * d).sum(axis=0, keepdims=True)
        sums_ref[1] += jnp.abs(d).sum(axis=0, keepdims=True)

    # --- DiffDivReg KL term (frame gaps, t > 0) ------------------------------
    @pl.when(t > 0)
    def _ddr():
        inv_tau = jnp.float32(1.0 / tau)
        xp = (p - prev_p[...]) * inv_tau
        xg = (g - prev_g[...]) * inv_tau
        # Full-frame softmax (reference softmaxes over the flattened frame).
        ep = jnp.exp(xp - jnp.max(xp))
        eg = jnp.exp(xg - jnp.max(xg))
        sp = ep * (1.0 / jnp.sum(ep))
        sg = eg * (1.0 / jnp.sum(eg))
        # Exact eps placement of the PyTorch reference.
        term = sp * jnp.log(sp / (sg + eps) + eps)
        ddr_ref[...] += jnp.sum(term).reshape(1, 1)

    # Stash current frame as "previous" for the next time step.
    prev_p[...] = p
    prev_g[...] = g


def _ddr_row_kernel(p_ref, g_ref, out_ref, prev_p, prev_g, *, tau, eps):
    """DDR fallback for frames whose flattened size is not a multiple of 128.

    Grid (B, T); blocks are single (1, 1, D) frames; previous frame carried in
    VMEM scratch; per-batch (1, 1) accumulator resident across t.
    """
    t = pl.program_id(1)

    @pl.when(t == 0)
    def _init():
        out_ref[...] = jnp.zeros_like(out_ref)

    @pl.when(t > 0)
    def _accum():
        inv_tau = jnp.float32(1.0 / tau)
        xp = (p_ref[0].astype(jnp.float32) - prev_p[...]) * inv_tau   # (1, D)
        xg = (g_ref[0].astype(jnp.float32) - prev_g[...]) * inv_tau
        ep = jnp.exp(xp - jnp.max(xp, axis=-1, keepdims=True))
        eg = jnp.exp(xg - jnp.max(xg, axis=-1, keepdims=True))
        sp = ep * (1.0 / jnp.sum(ep, axis=-1, keepdims=True))
        sg = eg * (1.0 / jnp.sum(eg, axis=-1, keepdims=True))
        term = sp * jnp.log(sp / (sg + eps) + eps)
        out_ref[...] += jnp.sum(term).reshape(1, 1)

    prev_p[...] = p_ref[0].astype(jnp.float32)
    prev_g[...] = g_ref[0].astype(jnp.float32)


# ----------------------------------------------------------------- wrappers --

_TM_MAX = 4096   # 4096x128 f32 = 2 MiB/block; 2 inputs x 2 buffers = 8 MiB VMEM
_CHUNK = 64      # inner strip-mine chunk (rows): keeps live vregs small


def _sum_sq_abs(pred, gt):
    """Single fused pass: (sum((p-g)^2), sum(|p-g|), n) over all elements."""
    x = pred.reshape(-1)
    y = gt.reshape(-1)
    n = int(x.shape[0])

    lane_pad = (-n) % 128
    if lane_pad:
        # Rare ragged case (video tensors are essentially always 128-aligned).
        # TODO(synk): handle the <128-element tail in-kernel to avoid this copy.
        x = jnp.pad(x, (0, lane_pad))
        y = jnp.pad(y, (0, lane_pad))
    m = (n + lane_pad) // 128
    x2 = x.reshape(m, 128)
    y2 = y.reshape(m, 128)

    if m >= _TM_MAX:
        tm, chunk = _TM_MAX, _CHUNK
        masked = (m % tm) != 0             # mask only the final (tail) block
    else:
        row_pad = (-m) % 8                 # tiny inputs only: keep (*,8,128) legal
        if row_pad:
            x2 = jnp.pad(x2, ((0, row_pad), (0, 0)))
            y2 = jnp.pad(y2, ((0, row_pad), (0, 0)))
            m += row_pad
        tm = m                             # single full-array block
        chunk = _CHUNK if m % _CHUNK == 0 else 8
        masked = False

    nb = pl.cdiv(m, tm)
    itemsize = jnp.dtype(x2.dtype).itemsize

    out = pl.pallas_call(
        functools.partial(_sums_kernel, m_rows=m, chunk=chunk, masked=masked),
        out_shape=jax.ShapeDtypeStruct((2, 8, 128), jnp.float32),
        grid_spec=pltpu.PrefetchScalarGridSpec(
            num_scalar_prefetch=0,
            grid=(nb,),
            in_specs=[pl.BlockSpec((tm, 128), lambda s: (s, 0)),
                      pl.BlockSpec((tm, 128), lambda s: (s, 0))],
            out_specs=pl.BlockSpec((2, 8, 128), lambda s: (0, 0, 0)),
        ),
        compiler_params=pltpu.CompilerParams(
            dimension_semantics=("arbitrary",)),
        cost_estimate=pl.CostEstimate(
            flops=5 * n, transcendentals=0, bytes_accessed=2 * n * itemsize),
    )(x2, y2)

    sums = jnp.sum(out, axis=(1, 2))       # tiny final cross-lane reduce
    return sums[0], sums[1], jnp.float32(n)


def _fused_frame_losses(pred, gt, tau=0.1, eps=1e-12):
    """One HBM pass over pred/gt producing MSE/L1 sums and the DDR mean.

    Requires D = prod(frame shape) % 128 == 0 (lane-dense frames) and T > 2.
    """
    B, T = int(pred.shape[0]), int(pred.shape[1])
    D = 1
    for s in pred.shape[2:]:
        D *= int(s)
    assert D % 128 == 0 and T > 2
    R = D // 128
    sub = 8 if R % 8 == 0 else 1           # sublane-dense partials when possible

    p4 = pred.reshape(B, T, R, 128)
    g4 = gt.reshape(B, T, R, 128)
    itemsize = jnp.dtype(p4.dtype).itemsize
    n = B * T * D

    # TODO(synk): for very large frames (per-frame VMEM footprint ~24*D bytes
    # over the scoped-VMEM default), switch to a chunked online-softmax over
    # 128-lane row slabs and set vmem_limit_bytes explicitly.
    sums, ddr = pl.pallas_call(
        functools.partial(_frame_kernel, tau=tau, eps=eps, sub=sub),
        out_shape=(jax.ShapeDtypeStruct((2, sub, 128), jnp.float32),
                   jax.ShapeDtypeStruct((1, 1), jnp.float32)),
        grid_spec=pltpu.PrefetchScalarGridSpec(
            num_scalar_prefetch=0,
            grid=(B, T),
            in_specs=[pl.BlockSpec((1, 1, R, 128), lambda b, t: (b, t, 0, 0)),
                      pl.BlockSpec((1, 1, R, 128), lambda b, t: (b, t, 0, 0))],
            out_specs=(pl.BlockSpec((2, sub, 128), lambda b, t: (0, 0, 0)),
                       pl.BlockSpec((1, 1), lambda b, t: (0, 0))),
            scratch_shapes=[pltpu.VMEM((R, 128), jnp.float32),   # prev pred frame
                            pltpu.VMEM((R, 128), jnp.float32)],  # prev gt frame
        ),
        compiler_params=pltpu.CompilerParams(
            dimension_semantics=("arbitrary", "arbitrary")),
        cost_estimate=pl.CostEstimate(
            flops=12 * n, transcendentals=3 * B * (T - 1) * D,
            bytes_accessed=2 * n * itemsize),
    )(p4, g4)

    s_sq = jnp.sum(sums[0])
    s_ab = jnp.sum(sums[1])
    ddr_mean = ddr[0, 0] / jnp.float32(B * (T - 1) * D)
    return s_sq, s_ab, jnp.float32(n), ddr_mean


def mse_loss(pred, gt):
    s_sq, _, n = _sum_sq_abs(pred, gt)
    return s_sq / n


def l1_loss(pred, gt):
    _, s_ab, n = _sum_sq_abs(pred, gt)
    return s_ab / n


def ddr_loss(pred, gt, tau=0.1, eps=1e-12):
    B, T = int(pred.shape[0]), int(pred.shape[1])
    if T <= 2:
        # Matches the PyTorch DiffDivReg reference (returns 0.0 for T <= 2).
        return jnp.float32(0.0)
    D = 1
    for s in pred.shape[2:]:
        D *= int(s)
    if D % 128 == 0:
        # Lane-dense path (the extra MSE/L1 sums it also produces are ~free).
        _, _, _, ddr = _fused_frame_losses(pred, gt, tau=tau, eps=eps)
        return ddr
    # Fallback for non-lane-aligned frames: (1, D) row layout (block spans the
    # full last dim, so no 128-divisibility requirement).
    p3 = pred.reshape(B, T, D)
    g3 = gt.reshape(B, T, D)
    out = pl.pallas_call(
        functools.partial(_ddr_row_kernel, tau=tau, eps=eps),
        out_shape=jax.ShapeDtypeStruct((B, 1), jnp.float32),
        grid_spec=pltpu.PrefetchScalarGridSpec(
            num_scalar_prefetch=0,
            grid=(B, T),
            in_specs=[pl.BlockSpec((1, 1, D), lambda b, t: (b, t, 0)),
                      pl.BlockSpec((1, 1, D), lambda b, t: (b, t, 0))],
            out_specs=pl.BlockSpec((1, 1), lambda b, t: (b, 0)),
            scratch_shapes=[pltpu.VMEM((1, D), jnp.float32),
                            pltpu.VMEM((1, D), jnp.float32)],
        ),
        compiler_params=pltpu.CompilerParams(
            dimension_semantics=("arbitrary", "arbitrary")),
    )(p3, g3)
    return jnp.sum(out) / jnp.float32(B * (T - 1) * D)


_LOSS_FUNCTIONS_DICT = dict(mse_loss=mse_loss, L1_loss=l1_loss, ddr_loss=ddr_loss)


class WeightedLoss:
    """JAX/Pallas port of predbench WeightedLoss (forward only).

    When ddr_loss is requested (and frames are lane-aligned), mse/L1/ddr are all
    produced by a single fused HBM pass over pred/gt; otherwise mse/L1 still
    share one fused reduction pass.
    """

    def __init__(self, loss_functions_list=("mse_loss",), loss_weights_list=(1.0,)):
        assert len(loss_functions_list) == len(loss_weights_list)
        for k in loss_functions_list:
            assert k in _LOSS_FUNCTIONS_DICT, k
        self.loss_names = list(loss_functions_list)
        self.loss_weights = list(loss_weights_list)

    def __call__(self, pred, gt):
        need_ew = any(k in ("mse_loss", "L1_loss") for k in self.loss_names)
        need_ddr = "ddr_loss" in self.loss_names
        T = int(pred.shape[1])
        D = 1
        for s in pred.shape[2:]:
            D *= int(s)

        vals = {}
        if need_ddr and T > 2 and D % 128 == 0:
            # One fused HBM pass produces everything.
            s_sq, s_ab, n, ddr = _fused_frame_losses(pred, gt)
            vals["mse_loss"] = s_sq / n
            vals["L1_loss"] = s_ab / n
            vals["ddr_loss"] = ddr
        else:
            if need_ew:
                s_sq, s_ab, n = _sum_sq_abs(pred, gt)
                vals["mse_loss"] = s_sq / n
                vals["L1_loss"] = s_ab / n
            if need_ddr:
                vals["ddr_loss"] = ddr_loss(pred, gt)

        losses = dict()
        for idx, k in enumerate(self.loss_names):
            losses[k] = self.loss_weights[idx] * vals[k]
        return losses


# -------------------------------------------------------------- reference ----

def _ref_losses(pred, gt, weights, tau=0.1, eps=1e-12):
    p = pred.astype(jnp.float32)
    g = gt.astype(jnp.float32)
    B, T = p.shape[0], p.shape[1]
    mse = jnp.mean((p - g) ** 2)
    l1 = jnp.mean(jnp.abs(p - g))
    gap_p = (p[:, 1:] - p[:, :-1]).reshape(B, T - 1, -1)
    gap_g = (g[:, 1:] - g[:, :-1]).reshape(B, T - 1, -1)
    sp = jax.nn.softmax(gap_p / tau, axis=-1)
    sg = jax.nn.softmax(gap_g / tau, axis=-1)
    ddr = jnp.mean(sp * jnp.log(sp / (sg + eps) + eps))
    return dict(mse_loss=weights[0] * mse,
                L1_loss=weights[1] * l1,
                ddr_loss=weights[2] * ddr)


# -------------------------------------------------------------------- main ---

if __name__ == "__main__":
    key = jax.random.PRNGKey(0)
    k1, k2 = jax.random.split(key)
    # (B, T, C, H, W)
    pred = jax.random.normal(k1, (2, 8, 4, 16, 16), dtype=jnp.float32)
    gt = jax.random.normal(k2, (2, 8, 4, 16, 16), dtype=jnp.float32)

    weights = [1.0, 0.5, 0.2]
    model = WeightedLoss(["mse_loss", "L1_loss", "ddr_loss"], weights)
    losses = model(pred, gt)
    losses = jax.tree_util.tree_map(jax.block_until_ready, losses)

    ref = _ref_losses(pred, gt, weights)
    for k in losses:
        assert jnp.allclose(losses[k], ref[k], rtol=1e-4, atol=1e-5), (
            k, float(losses[k]), float(ref[k]))

    # default construction (mse only) exercises the standalone sums kernel.
    default_model = WeightedLoss()
    mse_only = default_model(pred, gt)["mse_loss"]
    jax.block_until_ready(mse_only)
    assert jnp.allclose(mse_only, ref["mse_loss"], rtol=1e-4, atol=1e-5), (
        float(mse_only), float(ref["mse_loss"]))

    print("KERNEL_OK")
</pallas_src>

<mosaic_0001>
module attributes {stable_mosaic.version = 11 : i64} {
  func.func @_frame_kernel(%arg0: i32, %arg1: i32, %arg2: memref<1x1x8x128xf32, #tpu.memory_space<vmem>>, %arg3: memref<1x1x8x128xf32, #tpu.memory_space<vmem>>, %arg4: memref<2x8x128xf32, #tpu.memory_space<vmem>>, %arg5: memref<1x1xf32, #tpu.memory_space<vmem>>, %arg6: memref<8x128xf32, #tpu.memory_space<vmem>>, %arg7: memref<8x128xf32, #tpu.memory_space<vmem>>) attributes {dimension_semantics = [#tpu.dimension_semantics<arbitrary>, #tpu.dimension_semantics<arbitrary>], iteration_bounds = array<i64: 2, 8>, scalar_prefetch = 0 : i64, scratch_operands = 2 : i64, tpu.core_type = #tpu.core_type<tc>, window_params = [{transform_indices = @transform_0, window_bounds = array<i64: 1, 1, 8, 128>}, {transform_indices = @transform_1, window_bounds = array<i64: 1, 1, 8, 128>}, {pipeline_mode = #tpu.pipeline_mode<synchronous>, transform_indices = @transform_2, window_bounds = array<i64: 2, 8, 128>}, {pipeline_mode = #tpu.pipeline_mode<synchronous>, transform_indices = @transform_3, window_bounds = array<i64: 1, 1>}]} {
    %c0_i32 = arith.constant 0 : i32
    %0 = arith.cmpi eq, %arg0, %c0_i32 : i32
    %c0_i32_0 = arith.constant 0 : i32
    %1 = arith.cmpi eq, %arg1, %c0_i32_0 : i32
    %2 = arith.andi %0, %1 : i1
    %3 = arith.extui %2 : i1 to i32
    %c0_i32_1 = arith.constant 0 : i32
    %4 = arith.cmpi ne, %3, %c0_i32_1 : i32
    scf.if %4 {
      %cst_27 = arith.constant 0.000000e+00 : f32
      %33 = vector.broadcast %cst_27 : f32 to vector<2x8x128xf32>
      %c0_28 = arith.constant 0 : index
      %c0_29 = arith.constant 0 : index
      %c0_30 = arith.constant 0 : index
      %34 = vector.load %arg4[%c0_28, %c0_29, %c0_30] : memref<2x8x128xf32, #tpu.memory_space<vmem>>, vector<2x8x128xf32>
      tpu.vector_store %arg4[%c0_28, %c0_29, %c0_30], %33 {strides = array<i32>} : memref<2x8x128xf32, #tpu.memory_space<vmem>>, vector<2x8x128xf32>,
      %cst_31 = arith.constant 0.000000e+00 : f32
      %35 = vector.broadcast %cst_31 : f32 to vector<1x1xf32>
      %c0_32 = arith.constant 0 : index
      %c0_33 = arith.constant 0 : index
      %36 = vector.load %arg5[%c0_32, %c0_33] : memref<1x1xf32, #tpu.memory_space<vmem>>, vector<1x1xf32>
      tpu.vector_store %arg5[%c0_32, %c0_33], %35 {strides = array<i32>} : memref<1x1xf32, #tpu.memory_space<vmem>>, vector<1x1xf32>,
    } else {
    }
    %c0 = arith.constant 0 : index
    %c0_2 = arith.constant 0 : index
    %c0_3 = arith.constant 0 : index
    %c0_4 = arith.constant 0 : index
    %5 = vector.load %arg2[%c0, %c0_2, %c0_3, %c0_4] : memref<1x1x8x128xf32, #tpu.memory_space<vmem>>, vector<1x1x8x128xf32>
    %6 = vector.shape_cast %5 : vector<1x1x8x128xf32> to vector<8x128xf32>
    %c0_5 = arith.constant 0 : index
    %c0_6 = arith.constant 0 : index
    %c0_7 = arith.constant 0 : index
    %c0_8 = arith.constant 0 : index
    %7 = vector.load %arg3[%c0_5, %c0_6, %c0_7, %c0_8] : memref<1x1x8x128xf32, #tpu.memory_space<vmem>>, vector<1x1x8x128xf32>
    %8 = vector.shape_cast %7 : vector<1x1x8x128xf32> to vector<8x128xf32>
    %9 = arith.subf %6, %8 : vector<8x128xf32>
    %c0_9 = arith.constant 0 : index
    %c0_10 = arith.constant 0 : index
    %c0_11 = arith.constant 0 : index
    %10 = vector.load %arg4[%c0_9, %c0_10, %c0_11] : memref<2x8x128xf32, #tpu.memory_space<vmem>>, vector<1x8x128xf32>
    %11 = vector.shape_cast %10 : vector<1x8x128xf32> to vector<8x128xf32>
    %12 = arith.mulf %9, %9 : vector<8x128xf32>
    %13 = vector.shape_cast %12 : vector<8x128xf32> to vector<1x8x128xf32>
    %cst = arith.constant dense<0.000000e+00> : vector<8x128xf32>
    %14 = vector.multi_reduction <add>, %13, %cst [0] : vector<1x8x128xf32> to vector<8x128xf32>
    %15 = arith.addf %11, %14 : vector<8x128xf32>
    %c0_12 = arith.constant 0 : index
    %c0_13 = arith.constant 0 : index
    %c0_14 = arith.constant 0 : index
    %16 = vector.load %arg4[%c0_12, %c0_13, %c0_14] : memref<2x8x128xf32, #tpu.memory_space<vmem>>, vector<1x8x128xf32>
    %17 = vector.shape_cast %16 : vector<1x8x128xf32> to vector<8x128xf32>
    %18 = vector.shape_cast %15 : vector<8x128xf32> to vector<1x8x128xf32>
    tpu.vector_store %arg4[%c0_12, %c0_13, %c0_14], %18 {strides = array<i32>} : memref<2x8x128xf32, #tpu.memory_space<vmem>>, vector<1x8x128xf32>,
    %c1 = arith.constant 1 : index
    %c0_15 = arith.constant 0 : index
    %c0_16 = arith.constant 0 : index
    %19 = vector.load %arg4[%c1, %c0_15, %c0_16] : memref<2x8x128xf32, #tpu.memory_space<vmem>>, vector<1x8x128xf32>
    %20 = vector.shape_cast %19 : vector<1x8x128xf32> to vector<8x128xf32>
    %21 = math.absf %9 : vector<8x128xf32>
    %22 = vector.shape_cast %21 : vector<8x128xf32> to vector<1x8x128xf32>
    %cst_17 = arith.constant dense<0.000000e+00> : vector<8x128xf32>
    %23 = vector.multi_reduction <add>, %22, %cst_17 [0] : vector<1x8x128xf32> to vector<8x128xf32>
    %24 = arith.addf %20, %23 : vector<8x128xf32>
    %c1_18 = arith.constant 1 : index
    %c0_19 = arith.constant 0 : index
    %c0_20 = arith.constant 0 : index
    %25 = vector.load %arg4[%c1_18, %c0_19, %c0_20] : memref<2x8x128xf32, #tpu.memory_space<vmem>>, vector<1x8x128xf32>
    %26 = vector.shape_cast %25 : vector<1x8x128xf32> to vector<8x128xf32>
    %27 = vector.shape_cast %24 : vector<8x128xf32> to vector<1x8x128xf32>
    tpu.vector_store %arg4[%c1_18, %c0_19, %c0_20], %27 {strides = array<i32>} : memref<2x8x128xf32, #tpu.memory_space<vmem>>, vector<1x8x128xf32>,
    %c0_i32_21 = arith.constant 0 : i32
    %28 = arith.cmpi sgt, %arg1, %c0_i32_21 : i32
    %29 = arith.extui %28 : i1 to i32
    %c0_i32_22 = arith.constant 0 : i32
    %30 = arith.cmpi ne, %29, %c0_i32_22 : i32
    scf.if %30 {
      %c0_27 = arith.constant 0 : index
      %c0_28 = arith.constant 0 : index
      %33 = vector.load %arg6[%c0_27, %c0_28] : memref<8x128xf32, #tpu.memory_space<vmem>>, vector<8x128xf32>
      %34 = arith.subf %6, %33 : vector<8x128xf32>
      %cst_29 = arith.constant 1.000000e+01 : f32
      %35 = vector.broadcast %cst_29 : f32 to vector<8x128xf32>
      %36 = arith.mulf %34, %35 : vector<8x128xf32>
      %c0_30 = arith.constant 0 : index
      %c0_31 = arith.constant 0 : index
      %37 = vector.load %arg7[%c0_30, %c0_31] : memref<8x128xf32, #tpu.memory_space<vmem>>, vector<8x128xf32>
      %38 = arith.subf %8, %37 : vector<8x128xf32>
      %cst_32 = arith.constant 1.000000e+01 : f32
      %39 = vector.broadcast %cst_32 : f32 to vector<8x128xf32>
      %40 = arith.mulf %38, %39 : vector<8x128xf32>
      %41 = vector.shape_cast %36 : vector<8x128xf32> to vector<1x8x128xf32>
      %cst_33 = arith.constant dense<0xFF800000> : vector<1xf32>
      %42 = vector.multi_reduction <maximumf>, %41, %cst_33 [1, 2] : vector<1x8x128xf32> to vector<1xf32>
      %43 = vector.shape_cast %42 : vector<1xf32> to vector<1x1x1xf32>
      %44 = vector.extract %43[0, 0, 0] : f32 from vector<1x1x1xf32>
      %45 = vector.broadcast %44 : f32 to vector<8x128xf32>
      %46 = arith.subf %36, %45 : vector<8x128xf32>
      %47 = math.exp %46 : vector<8x128xf32>
      %48 = vector.shape_cast %40 : vector<8x128xf32> to vector<1x8x128xf32>
      %cst_34 = arith.constant dense<0xFF800000> : vector<1xf32>
      %49 = vector.multi_reduction <maximumf>, %48, %cst_34 [1, 2] : vector<1x8x128xf32> to vector<1xf32>
      %50 = vector.shape_cast %49 : vector<1xf32> to vector<1x1x1xf32>
      %51 = vector.extract %50[0, 0, 0] : f32 from vector<1x1x1xf32>
      %52 = vector.broadcast %51 : f32 to vector<8x128xf32>
      %53 = arith.subf %40, %52 : vector<8x128xf32>
      %54 = math.exp %53 : vector<8x128xf32>
      %55 = vector.shape_cast %47 : vector<8x128xf32> to vector<1x8x128xf32>
      %cst_35 = arith.constant dense<0.000000e+00> : vector<1xf32>
      %56 = vector.multi_reduction <add>, %55, %cst_35 [1, 2] : vector<1x8x128xf32> to vector<1xf32>
      %57 = vector.shape_cast %56 : vector<1xf32> to vector<1x1x1xf32>
      %58 = vector.extract %57[0, 0, 0] : f32 from vector<1x1x1xf32>
      %cst_36 = arith.constant 1.000000e+00 : f32
      %59 = arith.divf %cst_36, %58 : f32
      %60 = vector.broadcast %59 : f32 to vector<8x128xf32>
      %61 = arith.mulf %47, %60 : vector<8x128xf32>
      %62 = vector.shape_cast %54 : vector<8x128xf32> to vector<1x8x128xf32>
      %cst_37 = arith.constant dense<0.000000e+00> : vector<1xf32>
      %63 = vector.multi_reduction <add>, %62, %cst_37 [1, 2] : vector<1x8x128xf32> to vector<1xf32>
      %64 = vector.shape_cast %63 : vector<1xf32> to vector<1x1x1xf32>
      %65 = vector.extract %64[0, 0, 0] : f32 from vector<1x1x1xf32>
      %cst_38 = arith.constant 1.000000e+00 : f32
      %66 = arith.divf %cst_38, %65 : f32
      %67 = vector.broadcast %66 : f32 to vector<8x128xf32>
      %68 = arith.mulf %54, %67 : vector<8x128xf32>
      %cst_39 = arith.constant 9.99999996E-13 : f32
      %69 = vector.broadcast %cst_39 : f32 to vector<8x128xf32>
      %70 = arith.addf %68, %69 : vector<8x128xf32>
      %71 = arith.divf %61, %70 : vector<8x128xf32>
      %cst_40 = arith.constant 9.99999996E-13 : f32
      %72 = vector.broadcast %cst_40 : f32 to vector<8x128xf32>
      %73 = arith.addf %71, %72 : vector<8x128xf32>
      %74 = math.log %73 : vector<8x128xf32>
      %75 = arith.mulf %61, %74 : vector<8x128xf32>
      %c0_41 = arith.constant 0 : index
      %c0_42 = arith.constant 0 : index
      %76 = vector.load %arg5[%c0_41, %c0_42] : memref<1x1xf32, #tpu.memory_space<vmem>>, vector<1x1xf32>
      %77 = vector.shape_cast %75 : vector<8x128xf32> to vector<1x8x128xf32>
      %cst_43 = arith.constant dense<0.000000e+00> : vector<1xf32>
      %78 = vector.multi_reduction <add>, %77, %cst_43 [1, 2] : vector<1x8x128xf32> to vector<1xf32>
      %79 = vector.shape_cast %78 : vector<1xf32> to vector<1x1x1xf32>
      %80 = vector.extract %79[0, 0, 0] : f32 from vector<1x1x1xf32>
      %81 = vector.broadcast %80 : f32 to vector<1x1xf32>
      %82 = arith.addf %76, %81 : vector<1x1xf32>
      %c0_44 = arith.constant 0 : index
      %c0_45 = arith.constant 0 : index
      %83 = vector.load %arg5[%c0_44, %c0_45] : memref<1x1xf32, #tpu.memory_space<vmem>>, vector<1x1xf32>
      tpu.vector_store %arg5[%c0_44, %c0_45], %82 {strides = array<i32>} : memref<1x1xf32, #tpu.memory_space<vmem>>, vector<1x1xf32>,
    } else {
    }
    %c0_23 = arith.constant 0 : index
    %c0_24 = arith.constant 0 : index
    %31 = vector.load %arg6[%c0_23, %c0_24] : memref<8x128xf32, #tpu.memory_space<vmem>>, vector<8x128xf32>
    tpu.vector_store %arg6[%c0_23, %c0_24], %6 {strides = array<i32>} : memref<8x128xf32, #tpu.memory_space<vmem>>, vector<8x128xf32>,
    %c0_25 = arith.constant 0 : index
    %c0_26 = arith.constant 0 : index
    %32 = vector.load %arg7[%c0_25, %c0_26] : memref<8x128xf32, #tpu.memory_space<vmem>>, vector<8x128xf32>
    tpu.vector_store %arg7[%c0_25, %c0_26], %8 {strides = array<i32>} : memref<8x128xf32, #tpu.memory_space<vmem>>, vector<8x128xf32>,
    return
  }
  func.func @transform_0(%arg0: i32, %arg1: i32) -> (i32, i32, i32, i32) {
    %c0_i32 = arith.constant 0 : i32
    %c0_i32_0 = arith.constant 0 : i32
    %c0_i32_1 = arith.constant 0 : i32
    return %arg0, %arg1, %c0_i32, %c0_i32_0 : i32, i32, i32, i32
  }
  func.func @transform_1(%arg0: i32, %arg1: i32) -> (i32, i32, i32, i32) {
    %c0_i32 = arith.constant 0 : i32
    %c0_i32_0 = arith.constant 0 : i32
    %c0_i32_1 = arith.constant 0 : i32
    return %arg0, %arg1, %c0_i32, %c0_i32_0 : i32, i32, i32, i32
  }
  func.func @transform_2(%arg0: i32, %arg1: i32) -> (i32, i32, i32) {
    %c0_i32 = arith.constant 0 : i32
    %c0_i32_0 = arith.constant 0 : i32
    %c0_i32_1 = arith.constant 0 : i32
    %c0_i32_2 = arith.constant 0 : i32
    return %c0_i32, %c0_i32_0, %c0_i32_1 : i32, i32, i32
  }
  func.func @transform_3(%arg0: i32, %arg1: i32) -> (i32, i32) {
    %c0_i32 = arith.constant 0 : i32
    %c0_i32_0 = arith.constant 0 : i32
    %c0_i32_1 = arith.constant 0 : i32
    return %c0_i32, %c0_i32_0 : i32, i32
  }
}

</mosaic_0001>

<bundles_post_ra>
// kernel: tpu_custom_call.1
= control target key start
LH: loop header
LB: loop body
LE: loop exit
PB: predicated region body
PF: predicated region fallthrough
CT: control target
= control target key end

     0   :  { %9 = vsyncpa [#allocation5], 0  ;;  %s1003_s0 = inlined_call_operand.hbm [shape: f32[2,8,8,128], index: 0, kind: input, shape index: {}]   ;;  %s1004_s1 = inlined_call_operand.hbm [shape: f32[2,8,8,128], index: 1, kind: input, shape index: {}]   ;;  %s1005_s2 = inlined_call_operand.hbm [shape: f32[2,8,128], index: 2, kind: output, shape index: {0}]   ;;  %s1006_s3 = inlined_call_operand.hbm [shape: f32[1,1], index: 3, kind: output, shape index: {1}]  }
   0x1   :  { %11 = vsyncpa [#allocation5 + $0x1], 0 }
   0x2   :  { %12 = vsyncpa [#allocation8], 0 }
   0x3   :  { %14 = vsyncpa [#allocation8 + $0x1], 0 }
   0x4   :  { %15 = vsyncpa [#allocation6], 0 }
   0x5   :  { %16 = vsyncpa [#allocation11], 0  ;;  %s810_s12 = smov 0   ;;  %s812_s13 = smov 0  }
   0x6   :  { %s814_s14 = smov 0   ;;  %s816_s15 = smov 0  }
   0x7   :  { %s818_s16 = smov 0   ;;  %s820_s17 = smov 0  }
   0x8   :  { %s822_s18 = smov 0   ;;  %s824_s19 = smov 0  }
   0x9 LB: > { %s461_s20 = sadd.s32 4294967295, %s781_s19   ;;  %s31_s21 = sadd.s32 1, %s773_s17  ;;  %s781_s19 = sphi %s824_s19, %s22_s19   ;;  %s777_s18 = sphi %s822_s18, %s1018_s18   ;;  %s773_s17 = sphi %s820_s17, %s1017_s17   ;;  %s769_s16 = sphi %s818_s16, %s1016_s16   ;;  %s765_s15 = sphi %s816_s15, %s1015_s15   ;;  %s761_s14 = sphi %s814_s14, %s1014_s14   ;;  %s757_s13 = sphi %s812_s13, %s1013_s13   ;;  %s753_s12 = sphi %s810_s12, %s1012_s12  }
   0xa   : > { %p32_p0 = scmp.ge.s32.totalorder %s31_s21, 8  ;;  %s34_s22 = sadd.s32 1, %s777_s18 }
   0xb   : > { %s43_s23 = sadd.s32 1, %s761_s14  ;;  %p50_p1 = scmp.ne.s32.totalorder %s761_s14, %s757_s13 }
   0xc   : > { %s1020_s21 = smov (%p32_p0, %s31_s21), 0  ;;  %s1022_s22 = smov (!%p32_p0, %s34_s22), %s777_s18 }
   0xd   : > { %s39_s24 = ssub.s32 %s773_s17, %s1020_s21  ;;  %p51_p2 = scmp.eq.s32.totalorder %s781_s19, 0 }
   0xe   : > { %p36_p3 = scmp.ge.s32.totalorder %s1022_s22, 2  ;;  %p56_p4 = scmp.ne.s32.totalorder %s757_s13, %s753_s12 }
   0xf   : > { %p861_p5 = por %p51_p2, %p50_p1  ;;  %p57_p6 = scmp.eq.s32.totalorder %s461_s20, 0 }
  0x10   : > { %s1024_s22 = smov (%p36_p3, %s1022_s22), 0  ;;  %p513_p8 = scmp.lt.s32.totalorder %s781_s19, 16 }
  0x11   : > { %p869_p7 = por %p57_p6, %p56_p4  ;;  %s38_s27 = ssub.s32 %s777_s18, %s1024_s22 }
  0x12   : > { %s40_s28 = sor.u32 %s39_s24, %s38_s27  ;;  %s877_s29 = sand.u32 1, %s761_s14  }
  0x13   : > { %p41_p9 = scmp.eq.s32.totalorder %s40_s28, 0  ;;  %s464_s30 = sshll.u32 %s877_s29, 3 }
  0x14   : > { %s465_s4 = sshll.u32 %s777_s18, 3  ;;  %s154_s8 = scalar_lea.vmem [#allocation4], %s464_s30 }
  0x15   : > { %s882_s5 = scalar_select %p41_p9, %s761_s14, %s43_s23  }
  0x16   : > { %s159_s6 = sadd.s32 %s773_s17, %s465_s4  ;;  %s163_s9 = sshll.u32 %s154_s8, 4  ;;  %s164_s9 = int_to_ptr.vmem [resolvable:$true] %s163_s9 }
  0x17   : > { %s466_s7 = sshll.u32 %s159_s6, 7  ;;  %p894_p10 = pnand %p513_p8, %p861_p5 }
  0x18   : > { %s161_s12 = scalar_lea.hbm %s1003_s0, %s466_s7  ;;  %p470_p11 = scmp.ge.s32.totalorder %s781_s19, 1 }
  0x19   : > { %p188_p12 = scmp.lt.s32.totalorder %s781_s19, 17  ;;  %s151_s23 = scalar_lea.sflag [#allocation5], %s877_s29 }
  0x1a   : > { %p601_p13 = pneg %p894_p10  ;;  %s612_s27 = scalar_lea.vmem %s164_s9, 128 }
  0x1b   : > { %p613_p0 = scmp.ne.s32.totalorder %s164_s9, %s612_s27  ;;  %s783_s28 = smov [#allocation4]  }
  0x1c   : > { %s617_s25 = sshll.u32 %s783_s28, 4  ;;  %s618_s25 = int_to_ptr.vmem [resolvable:$false] %s617_s25 }
  0x1d   : > { %p615_p1 = pnand %p613_p0, %p601_p13  ;;  %s619_s4 = scalar_lea.vmem %s618_s25, 256 }
  0x1e   : > { %p620_p3 = scmp.lt.s32.totalorder %s164_s9, %s618_s25  ;;  %p621_p4 = scmp.lt.s32.totalorder %s619_s4, %s612_s27 }
  0x1f   : > { %p616_p2 = pneg %p615_p1 }
  0x20   : > { %p622_p5 = por %p621_p4, %p620_p3 }
  0x22   : > { %p623_p6 = pnand %p622_p5, %p616_p2 }
  0x24   : > { %626 = shalt.err (!%p623_p6)
}
  0x25   : > { %509 = dma.hbm_to_vmem [thread:$0]  (!%p894_p10), %s161_s12, 128, %s164_s9, %s151_s23  }
  0x26   : > { %p912_p8 = pnand %p470_p11, %p188_p12  ;;  %s181_s11 = scalar_lea.hbm %s1004_s1, %s466_s7 }
  0x27   : > { %s174_s27 = scalar_lea.vmem [#allocation7], %s464_s30  ;;  %s171_s25 = scalar_lea.sflag [#allocation8], %s877_s29 }
  0x28   : > { %s183_s28 = sshll.u32 %s174_s27, 4  ;;  %s784_s9 = smov [#allocation7]   ;;  %s184_s28 = int_to_ptr.vmem [resolvable:$true] %s183_s28 }
  0x29   : > { %s640_s4 = scalar_lea.vmem %s184_s28, 128  ;;  %s645_s12 = sshll.u32 %s784_s9, 4  ;;  %s646_s12 = int_to_ptr.vmem [resolvable:$false] %s645_s12 }
  0x2a   : > { %p641_p9 = scmp.ne.s32.totalorder %s184_s28, %s640_s4  ;;  %s647_s23 = scalar_lea.vmem %s646_s12, 256 }
  0x2b   : > { %p648_p11 = scmp.lt.s32.totalorder %s184_s28, %s646_s12  ;;  %p649_p12 = scmp.lt.s32.totalorder %s647_s23, %s640_s4 }
  0x2c   : > { %p643_p0 = pnand %p641_p9, %p601_p13 }
  0x2d   : > { %p650_p2 = por %p649_p12, %p648_p11 }
  0x2e   : > { %p644_p1 = pneg %p643_p0 }
  0x30   : > { %p651_p3 = pnand %p650_p2, %p644_p1 }
  0x32   : > { %654 = shalt.err (!%p651_p3)
}
  0x33   : > { %512 = dma.hbm_to_vmem [thread:$0]  (!%p894_p10), %s181_s11, 128, %s184_s28, %s171_s25  }
  0x34   : > { %192 = sbr.rel (%p912_p8) target bundleno = 912 (0x390), region = 28  ;;  %s194_s29 = sand.u32 (!%p912_p8), 1, %s757_s13  }
  0x35   : > { %s471_s30 = sshll.u32 (!%p912_p8), %s194_s29, 3  ;;  %s195_s7 = scalar_lea.sflag (!%p912_p8), [#allocation5], %s194_s29 }
  0x36   : > { %s198_s8 = scalar_lea.vmem (!%p912_p8), [#allocation4], %s471_s30 }
  0x39   : > { %736 = dma.done.wait (%p869_p7), %s195_s7, 128  }
  0x3a   : > { %738 = vsyncadd (%p869_p7), %s195_s7, 4294967168  ;;  %s204_s10 = scalar_lea.sflag [#allocation8], %s194_s29  ;;  %s207_s27 = scalar_lea.vmem [#allocation7], %s471_s30 }
  0x3b   : > { %740 = dma.done.wait (%p869_p7), %s204_s10, 128  }
  0x3c   : > { %742 = vsyncadd (%p869_p7), %s204_s10, 4294967168  ;;  %p230_p10 = scmp.eq.s32.totalorder %s769_s16, 0  ;;  %p231_p13 = scmp.eq.s32.totalorder %s765_s15, 0 }
  0x3e   : > { %p232_p4 = pnand %p231_p13, %p230_p10 }
  0x40   : > { %235 = sbr.rel (%p232_p4) target bundleno = 72 (0x48), region = 40 }
  0x45   : > { %vm238_vm0 = vcmask 0   ;;  %v785_v0 = vmov 0.0  }
  0x46   : > { %236 = vst [vmem:[#allocation9] sm:$0xff] %v785_v0  ;;  %237 = vst [vmem:[#allocation9 + $0x8] sm:$0xff] %v785_v0 }
  0x47   : > { %239 = vst.msk [vmem:[#allocation10] sm:$0x1] %vm238_vm0, %v785_v0 }
  0x48 PF: > { %v940_v1 = vld [vmem:[%s198_s8] sm:$0xff]  ;;  %v942_v2 = vld [vmem:[%s207_s27] sm:$0xff]  ;;  %p473_p7 = scmp.le.s32.totalorder %s765_s15, 0 }
  0x49   : > { %v242_v3 = vsub.f32 %v940_v1, %v942_v2 }
  0x4b   : > { %v244_v6 = vmul.f32 %v242_v3, %v242_v3  ;;  %v250_v7 = vand.u32 2147483647, %v242_v3 }
  0x4c   : > { %257 = sbr.rel (%p473_p7) target bundleno = 881 (0x371), region = 44 }
  0x4d   : > { %v243_v4 = vld [vmem:[#allocation9] sm:$0xff]  ;;  %v249_v5 = vld [vmem:[#allocation9 + $0x8] sm:$0xff] }
  0x4e   : > { %v246_v8 = vadd.f32 %v244_v6, %v243_v4  ;;  %v252_v9 = vadd.f32 %v250_v7, %v249_v5 }
  0x50   : > { %247 = vst [vmem:[#allocation9] sm:$0xff] %v246_v8  ;;  %253 = vst [vmem:[#allocation9 + $0x8] sm:$0xff] %v252_v9 }
  0x51   : > { %v258_v10 = vld [vmem:[#allocation2] sm:$0xff]  ;;  %v261_v11 = vld [vmem:[#allocation3] sm:$0xff]  ;;  %vm337_vm1 = vcmask 0  }
  0x52   : > { %v259_v12 = vsub.f32 %v940_v1, %v258_v10  ;;  %v262_v13 = vsub.f32 %v942_v2, %v261_v11 }
  0x54   : > { %v260_v14 = vmul.f32 10.0, %v259_v12  ;;  %v263_v15 = vmul.f32 10.0, %v262_v13  ;;  %v325_v12 = vld [vmem:[#allocation10] sm:$0x1] }
  0x56   : > { %264 = vmax.xlane.f32.xlu0 %v260_v14 }
  0x5a   : > { %277 = vmax.xlane.f32.xlu0 %v263_v15 }
  0xdf   : > { %v265_v16 = vpop.xlane.xlu0 %264 }
  0xe0   : > { %v266_v17 = vrot.slane %v265_v16, 4 }
  0xe2   : > { %v267_v18 = vmax.f32 %v265_v16, %v266_v17 }
  0xe3   : > { %v278_v19 = vpop.xlane.xlu0 %277 }
  0xe4   : > { %v268_v20 = vrot.slane %v267_v18, 2  ;;  %v279_v21 = vrot.slane %v278_v19, 4 }
  0xe6   : > { %v269_v22 = vmax.f32 %v267_v18, %v268_v20  ;;  %v280_v23 = vmax.f32 %v278_v19, %v279_v21 }
  0xe8   : > { %v270_v24 = vrot.slane %v269_v22, 1  ;;  %v281_v25 = vrot.slane %v280_v23, 2 }
  0xea   : > { %v271_v26 = vmax.f32 %v269_v22, %v270_v24  ;;  %v282_v27 = vmax.f32 %v280_v23, %v281_v25 }
  0xec   : > { %480 = vpush %v271_v26  ;;  %v283_v28 = vrot.slane %v282_v27, 1 }
  0xee   : > { %v284_v29 = vmax.f32 %v282_v27, %v283_v28 }
  0xf0   : > { %482 = vpush %v284_v29 }
 0x11d   : > { %s481_s15 = spop %480 }
 0x11e   : > { %v273_v30 = vstv %s481_s15 }
 0x11f   : > { %v274_v31 = vsub.f32 %v260_v14, %v273_v30 }
 0x121   : > { %v275_v32 = vmul.f32 1.442695, %v274_v31  ;;  %s483_s16 = spop %482 }
 0x122   : > { %v286_v33 = vstv %s483_s16 }
 0x123   : > { %587 = vpow2.f32 %v275_v32  ;;  %v287_v34 = vsub.f32 %v263_v15, %v286_v33 }
 0x125   : > { %v288_v35 = vmul.f32 1.442695, %v287_v34 }
 0x127   : > { %589 = vpow2.f32 %v288_v35 }
 0x130   : > { %v588_v36 = vpop.eup %587 }
 0x131   : > { %290 = vadd.xlane.f32.xlu1 %v588_v36 }
 0x134   : > { %v590_v37 = vpop.eup %589 }
 0x135   : > { %304 = vadd.xlane.f32.xlu1 %v590_v37 }
 0x1ba   : > { %v291_v38 = vpop.xlane.xlu1 %290 }
 0x1bb   : > { %v292_v39 = vrot.slane %v291_v38, 4 }
 0x1bd   : > { %v293_v40 = vadd.f32 %v292_v39, %v291_v38 }
 0x1be   : > { %v305_v45 = vpop.xlane.xlu1 %304 }
 0x1bf   : > { %v294_v41 = vrot.slane %v293_v40, 2  ;;  %v306_v46 = vrot.slane %v305_v45, 4 }
 0x1c1   : > { %v295_v42 = vadd.f32 %v294_v41, %v293_v40  ;;  %v307_v47 = vadd.f32 %v306_v46, %v305_v45 }
 0x1c3   : > { %v296_v43 = vrot.slane %v295_v42, 1  ;;  %v308_v49 = vrot.slane %v307_v47, 2 }
 0x1c5   : > { %v297_v44 = vadd.f32 %v296_v43, %v295_v42  ;;  %v309_v50 = vadd.f32 %v308_v49, %v307_v47 }
 0x1c7   : > { %484 = vpush %v297_v44  ;;  %v310_v51 = vrot.slane %v309_v50, 1 }
 0x1c9   : > { %v311_v53 = vadd.f32 %v310_v51, %v309_v50 }
 0x1f8   : > { %s485_s26 = spop %484 }
 0x1f9   : > { %v299_v48 = vstv %s485_s26 }
 0x1fa   : > { %591 = vrcp.f32 %v299_v48 }
 0x207   : > { %v592_v52 = vpop.eup %591 }
 0x208   : > { %486 = vpush %v592_v52 }
 0x209   : > { %488 = vpush %v311_v53 }
 0x239   : > { %s487_s24 = spop %486 }
 0x23a   : > { %s489_s6 = spop %488  ;;  %v302_v59 = vstv %s487_s24 }
 0x23b   : > { %v313_v54 = vstv %s489_s6  ;;  %v303_v60 = vmul.f32 %v588_v36, %v302_v59 }
 0x23c   : > { %593 = vrcp.f32 %v313_v54 }
 0x249   : > { %v594_v55 = vpop.eup %593 }
 0x24a   : > { %490 = vpush %v594_v55 }
 0x27b   : > { %s491_s11 = spop %490 }
 0x27c   : > { %v316_v56 = vstv %s491_s11 }
 0x27d   : > { %v317_v57 = vmul.f32 %v590_v37, %v316_v56 }
 0x27f   : > { %v318_v58 = vadd.f32 1e-12, %v317_v57 }
 0x281   : > { %595 = vrcp.f32 %v318_v58 }
 0x28e   : > { %v596_v61 = vpop.eup %595 }
 0x28f   : > { %v320_v62 = vmul.f32 %v596_v61, %v303_v60 }
 0x291   : > { %v321_v63 = vadd.f32 1e-12, %v320_v62 }
 0x293   : > { %597 = vlog2.f32 %v321_v63 }
 0x2a0   : > { %v598_v0 = vpop.eup %597 }
 0x2a1   : > { %v323_v3 = vmul.f32 0.6931472, %v598_v0 }
 0x2a3   : > { %v324_v4 = vmul.f32 %v323_v3, %v303_v60 }
 0x2a5   : > { %326 = vadd.xlane.f32.xlu0 %v324_v4 }
 0x32e   : > { %v327_v5 = vpop.xlane.xlu0 %326 }
 0x32f   : > { %v328_v6 = vrot.slane %v327_v5, 4 }
 0x331   : > { %v329_v7 = vadd.f32 %v328_v6, %v327_v5 }
 0x333   : > { %v330_v8 = vrot.slane %v329_v7, 2 }
 0x335   : > { %v331_v9 = vadd.f32 %v330_v8, %v329_v7 }
 0x337   : > { %v332_v10 = vrot.slane %v331_v9, 1 }
 0x339   : > { %v333_v11 = vadd.f32 %v332_v10, %v331_v9 }
 0x33b   : > { %492 = vpush %v333_v11 }
 0x36c   : > { %s493_s28 = spop %492 }
 0x36d   : > { %v335_v13 = vstv %s493_s28 }
 0x36e   : > { %v336_v14 = vadd.f32 %v335_v13, %v325_v12 }
 0x370   : > { %338 = vst.msk [vmem:[#allocation10] sm:$0x1] %vm337_vm1, %v336_v14 }
 0x371 PF: > { %339 = vst [vmem:[#allocation2] sm:$0xff] %v940_v1  ;;  %340 = vst [vmem:[#allocation3] sm:$0xff] %v942_v2  ;;  %p953_p5 = scmp.eq.s32.totalorder %s461_s20, 15  ;;  %s786_s4 = smov [#allocation9]  }
 0x372   : > { %s347_s9 = sshll.u32 %s786_s4, 4  ;;  %s348_s9 = int_to_ptr.vmem [resolvable:$true] %s347_s9 }
 0x373   : > { %s655_s12 = scalar_lea.vmem %s348_s9, 256  ;;  %p662_p0 = scmp.lt.s32.totalorder %s348_s9, %s348_s9 }
 0x374   : > { %p656_p6 = scmp.ne.s32.totalorder %s348_s9, %s655_s12  ;;  %p663_p1 = scmp.lt.s32.totalorder %s655_s12, %s655_s12 }
 0x376   : > { %p657_p8 = pnand %p656_p6, %p953_p5  ;;  %p664_p11 = por %p663_p1, %p662_p0 }
 0x378   : > { %p658_p9 = pneg %p657_p8 }
 0x37a   : > { %p665_p12 = pnand %p664_p11, %p658_p9 }
 0x37c   : > { %668 = shalt.err (!%p665_p12)
}
 0x37d   : > { %s787_s23 = smov 128   ;;  %s788_s20 = smov 8  }
 0x37e   : > { %499 = dma.vmem_to_hbm [thread:$0]  (%p953_p5), %s348_s9, 256, %s1005_s2, [#allocation6], %s787_s23, %s787_s23, %s788_s20  }
 0x37f   : > { %s789_s7 = smov [#allocation10]  }
 0x380   : > { %s361_s8 = sshll.u32 %s789_s7, 4  ;;  %s362_s8 = int_to_ptr.vmem [resolvable:$true] %s361_s8 }
 0x381   : > { %s679_s10 = scalar_lea.vmem %s362_s8, 16  ;;  %s685_s27 = scalar_lea.vmem %s362_s8, 32 }
 0x382   : > { %p680_p2 = scmp.ne.s32.totalorder %s362_s8, %s679_s10  ;;  %p686_p13 = scmp.lt.s32.totalorder %s362_s8, %s362_s8 }
 0x383   : > { %p687_p4 = scmp.lt.s32.totalorder %s685_s27, %s679_s10 }
 0x384   : > { %p681_p3 = pnand %p680_p2, %p953_p5 }
 0x385   : > { %p688_p7 = por %p687_p4, %p686_p13 }
 0x386   : > { %p682_p10 = pneg %p681_p3 }
 0x388   : > { %p689_p6 = pnand %p688_p7, %p682_p10 }
 0x38a   : > { %692 = shalt.err (!%p689_p6)
}
 0x38b   : > { %501 = dma.vmem_to_hbm [thread:$0]  (%p953_p5), %s362_s8, 16, %s1006_s3, [#allocation11]  }
 0x38c   : > { %744 = dma.done.wait (%p953_p5), [#allocation6], 256  }
 0x38d   : > { %746 = vsyncadd (%p953_p5), [#allocation6], 4294967040 }
 0x38e   : > { %748 = dma.done.wait (%p953_p5), [#allocation11], 16  }
 0x38f   : > { %750 = vsyncadd (%p953_p5), [#allocation11], 4294967280 }
 0x390 PF: > { %s22_s19 = sadd.s32 1, %s781_s19   ;;  %s1012_s12 = smov %s757_s13 }
 0x391   : > { %p19_p8 = scmp.ge.s32.totalorder %s22_s19, 18   ;;  %s1013_s13 = smov %s761_s14 }
 0x392   : > { %s1014_s14 = smov %s882_s5  ;;  %s1015_s15 = smov %s773_s17 }
 0x393   : > { %s1016_s16 = smov %s777_s18  ;;  %s1017_s17 = smov %s1020_s21 }
 0x394   : > { %s1018_s18 = smov %s1024_s22  ;;  %21 = sbr.rel (!%p19_p8) target bundleno = 9 (0x9), region = 95 }
 0x399   :  { %378 = vsyncpa [#allocation5], 1 }
 0x39a   :  { %380 = vsyncpa [#allocation5 + $0x1], 1 }
 0x39b   :  { %381 = vsyncpa [#allocation8], 1 }
 0x39c   :  { %383 = vsyncpa [#allocation8 + $0x1], 1 }
 0x39d   :  { %384 = vsyncpa [#allocation6], 1 }
 0x39e   :  { %386 = vsyncpa [#allocation6 + $0x1], 1 }
 0x39f   :  { %387 = vsyncpa [#allocation11], 1 }

</bundles_post_ra>
